<compile_context>
chip_gen: v6e
topology: v6e:2x2x1
jax: 0.10.0
libtpu: 0.0.40
codegen_flags: <defaults>
</compile_context>

<pallas_src>
import numpy as np
import jax
import jax.numpy as jnp
from jax import lax
from jax.experimental import pallas as pl
from jax.experimental.pallas import tpu as pltpu


# ---------------------------------------------------------------------------
# Host-side constants: 1-D linear 2x-upsample matrices (align_corners=False).
# ---------------------------------------------------------------------------
def _interp_matrix(s):
    """(2s, s) matrix U with (U @ x) = PyTorch linear 2x upsample of x."""
    o = np.arange(2 * s)
    src = np.maximum((o + 0.5) * 0.5 - 0.5, 0.0)
    i0 = np.floor(src).astype(np.int64)
    i1 = np.minimum(i0 + 1, s - 1)
    lam = (src - i0).astype(np.float32)
    u = np.zeros((2 * s, s), np.float32)
    u[o, i0] += 1.0 - lam
    u[o, i1] += lam
    return u


# ---------------------------------------------------------------------------
# Fused kernel: (conv folded into D-upsample) matmul + (H/W upsample) matmul
# for one (batch element, output-D block) grid step.
# ---------------------------------------------------------------------------
def up_conv_fused_kernel(b_ref, a_ref, x_ref, khw_ref, o_ref):
    """
    b_ref   : SMEM (Cout,)               conv bias (scalars)
    a_ref   : VMEM (Cout*tdb, Cin*D)     kron(W, UD) rows of this output-D block
    x_ref   : VMEM (Cin*D, H*W)          input slab for this batch element
    khw_ref : VMEM (H*W, 4*H*W)          kron(UH, UW)^T (H/W upsample+interleave)
    o_ref   : VMEM (Cout, tdb, 4*H*W)    output block, final NCDHW memory order
    """
    cout, tdb, _ = o_ref.shape

    x = x_ref[...].astype(jnp.float32)                       # (Cin*D, HW)

    # conv (folded into A) + D-axis upsample.  K = Cin*D is small, so HIGHEST
    # precision here is cheap and keeps f32 parity with PyTorch's conv.
    t = jnp.dot(a_ref[...], x,
                preferred_element_type=jnp.float32,
                precision=lax.Precision.HIGHEST)             # (Cout*tdb, HW)

    # H/W upsample + even/odd lane interleave in one lane-dense matmul for the
    # whole channel block (single large MXU op instead of 4 per-channel ones).
    r = jnp.dot(t, khw_ref[...],
                preferred_element_type=jnp.float32)          # (Cout*tdb, 4HW)

    # Bias passes through the (partition-of-unity) interpolation unchanged.
    for c in range(cout):                                    # Cout VPU adds
        o_ref[c] = (r[c * tdb:(c + 1) * tdb, :] + b_ref[c]).astype(o_ref.dtype)


# ---------------------------------------------------------------------------
# Output-D tile selection (sublane aligned, VMEM bounded, megacore friendly).
# ---------------------------------------------------------------------------
def _pick_tdb(d2, n, cout, hw4, out_itemsize):
    sub = 8 if out_itemsize >= 4 else 16
    cands = [t for t in range(sub, d2 + 1, sub) if d2 % t == 0]
    if not cands:
        # TODO(synk): pad D so 2D gets a multiple-of-sublane divisor instead of
        # falling back to one full-D block for awkward (odd) D.
        return d2
    budget = 8 * 1024 * 1024  # double-buffered output tile budget
    fitting = [t for t in cands
               if 2 * cout * t * hw4 * out_itemsize <= budget] or [cands[0]]
    tdb = max(fitting)
    # v7x has 2 TensorCores: make sure the grid has at least 2 steps.
    if n * (d2 // tdb) < 2:
        smaller = [t for t in fitting if n * (d2 // t) >= 2]
        if smaller:
            tdb = max(smaller)
    return tdb


# ---------------------------------------------------------------------------
# Wrapper: constant folding + layout prep (free reshapes only) + pallas_call
# ---------------------------------------------------------------------------
def up_conv_forward(x, weight, bias):
    """NCDHW forward of up_conv: Conv3d(kernel=1) + 2x trilinear upsample."""
    n, cin, d, h, w = x.shape
    cout = weight.shape[0]
    hw = h * w
    d2, h2, w2 = 2 * d, 2 * h, 2 * w
    hw4 = 4 * hw
    out_dtype = x.dtype
    itemsize = np.dtype(out_dtype).itemsize

    # Free contiguous reshape: rows ordered (ci, d) to match A's columns.
    x_flat = x.reshape(n, cin * d, hw)

    tdb = _pick_tdb(d2, n, cout, hw4, itemsize)
    nblk = d2 // tdb

    # Interpolation matrices (static shapes -> plain numpy at trace time).
    ud = jnp.asarray(_interp_matrix(d))                                # (2D, D)
    khw = jnp.asarray(np.kron(_interp_matrix(h), _interp_matrix(w)).T)  # (HW, 4HW)
    # TODO(synk): for large H*W replace the dense kron(UH,UW) matmul with a
    # separable W-then-H upsample (or pltpu.roll-based VPU blends); the dense
    # kron is O((HW)^2) FLOPs and 16*(HW)^2 bytes of VMEM.

    # Fold the 1x1x1 conv into the D-upsample: A[(c,od),(ci,dd)] = W[c,ci]*UD[od,dd],
    # then permute rows into output-D blocks so block j is a contiguous row slab
    # ordered (c, od-within-block) to match the o_ref block layout.
    w2d = weight.reshape(cout, cin).astype(jnp.float32)
    a_full = jnp.kron(w2d, ud)                                         # (Cout*2D, Cin*D)
    a_blk = jnp.transpose(a_full.reshape(cout, nblk, tdb, cin * d),
                          (1, 0, 2, 3)).reshape(nblk * cout * tdb, cin * d)

    b1d = bias.astype(jnp.float32)                                     # SMEM scalars

    # Constant kron(UH,UW)^T: single-buffer it when it is big (index never
    # changes, so the second pipeline buffer would be pure VMEM waste).
    khw_bytes = hw * hw4 * 4
    khw_spec = pl.BlockSpec((hw, hw4), lambda i, j: (0, 0))
    if khw_bytes > (1 << 20):
        try:
            khw_spec = pl.BlockSpec((hw, hw4), lambda i, j: (0, 0),
                                    pipeline_mode=pl.Buffered(1))
        except Exception:
            pass  # older pallas: fall back to default (double-buffered)

    # Raise the scoped VMEM limit only when the estimate exceeds the default.
    vmem_est = (2 * (cout * tdb * cin * d * 4          # A block (f32)
                     + cin * d * hw * itemsize         # x slab
                     + cout * tdb * hw4 * itemsize)    # output tile
                + 2 * khw_bytes + (2 << 20))
    cp_kwargs = dict(dimension_semantics=("parallel", "parallel"))
    if vmem_est > (24 << 20):
        cp_kwargs["vmem_limit_bytes"] = int(min(vmem_est, 64 << 20))

    out3 = pl.pallas_call(
        up_conv_fused_kernel,
        out_shape=jax.ShapeDtypeStruct((n, cout, d2, hw4), out_dtype),
        grid=(n, nblk),
        in_specs=[
            pl.BlockSpec(memory_space=pltpu.MemorySpace.SMEM),            # bias
            pl.BlockSpec((cout * tdb, cin * d), lambda i, j: (j, 0)),     # A block
            pl.BlockSpec((None, cin * d, hw), lambda i, j: (i, 0, 0)),    # x slab
            khw_spec,                                                     # kron(UH,UW)^T
        ],
        out_specs=pl.BlockSpec((None, cout, tdb, hw4),
                               lambda i, j: (i, 0, j, 0)),
        compiler_params=pltpu.CompilerParams(**cp_kwargs),
    )(b1d, a_blk, x_flat, khw)

    # TODO(synk): for very large D, additionally tile x over D using UD's band
    # structure (each tdb output rows need only tdb//2 + 2 input rows) via a
    # manual make_async_copy halo window instead of the full per-batch slab.

    # Final NCDHW result: a free contiguous reshape (no transposes).
    return out3.reshape(n, cout, d2, h2, w2)


# ---------------------------------------------------------------------------
# Pure-JAX reference (PyTorch semantics) for the sanity check.
# ---------------------------------------------------------------------------
def _ref_forward(x, weight, bias):
    n, cin, d, h, w = x.shape
    cout = weight.shape[0]
    xcl = jnp.transpose(x, (0, 2, 3, 4, 1))
    y = jnp.einsum("ndhwc,oc->ndhwo", xcl, weight.reshape(cout, cin),
                   precision=lax.Precision.HIGHEST) + bias

    def up_axis(v, axis):
        s = v.shape[axis]
        o = jnp.arange(2 * s)
        src = jnp.maximum((o + 0.5) * 0.5 - 0.5, 0.0)
        i0 = jnp.floor(src).astype(jnp.int32)
        i1 = jnp.minimum(i0 + 1, s - 1)
        lam = src - i0
        shape = [1] * v.ndim
        shape[axis] = 2 * s
        lam = lam.reshape(shape)
        return (jnp.take(v, i0, axis=axis) * (1.0 - lam)
                + jnp.take(v, i1, axis=axis) * lam)

    for ax in (1, 2, 3):
        y = up_axis(y, ax)
    return jnp.transpose(y, (0, 4, 1, 2, 3))


if __name__ == "__main__":
    N, Cin, Cout, D, H, W = 2, 8, 4, 8, 8, 8

    key = jax.random.PRNGKey(0)
    k1, k2, k3 = jax.random.split(key, 3)
    # Deterministic synthetic Conv3d(ch_in=8, ch_out=4, k=1) parameters.
    weight = jax.random.normal(k1, (Cout, Cin, 1, 1, 1), jnp.float32) * 0.1
    bias = jax.random.normal(k2, (Cout,), jnp.float32) * 0.1
    x = jax.random.normal(k3, (N, Cin, D, H, W), jnp.float32)

    fwd = jax.jit(up_conv_forward)
    out = jax.block_until_ready(fwd(x, weight, bias))
    assert out.shape == (N, Cout, 2 * D, 2 * H, 2 * W), out.shape

    ref = jax.block_until_ready(_ref_forward(x, weight, bias))
    # Tolerance covers the default-precision (bf16-mantissa) MXU pass in the
    # H/W interpolation matmul; conv + D-interp run at HIGHEST precision.
    err = float(jnp.max(jnp.abs(out - ref)))
    assert jnp.allclose(out, ref, atol=1e-2, rtol=1e-3), err

    print("KERNEL_OK")
</pallas_src>

<mosaic_0001>
module attributes {stable_mosaic.version = 11 : i64} {
  func.func @up_conv_fused_kernel(%arg0: i32, %arg1: i32, %arg2: memref<4xf32, #tpu.memory_space<smem>>, %arg3: memref<64x64xf32, #tpu.memory_space<vmem>>, %arg4: memref<1x64x64xf32, #tpu.memory_space<vmem>>, %arg5: memref<64x256xf32, #tpu.memory_space<vmem>>, %arg6: memref<1x4x16x256xf32, #tpu.memory_space<vmem>>) attributes {dimension_semantics = [#tpu.dimension_semantics<parallel>, #tpu.dimension_semantics<parallel>], iteration_bounds = array<i64: 2, 1>, scalar_prefetch = 0 : i64, scratch_operands = 0 : i64, tpu.core_type = #tpu.core_type<tc>, window_params = [{transform_indices = @transform_0, window_bounds = array<i64: 4>}, {transform_indices = @transform_1, window_bounds = array<i64: 64, 64>}, {transform_indices = @transform_2, window_bounds = array<i64: 1, 64, 64>}, {pipeline_mode = #tpu.pipeline_mode<synchronous>, transform_indices = @transform_3, window_bounds = array<i64: 64, 256>}, {transform_indices = @transform_4, window_bounds = array<i64: 1, 4, 16, 256>}]} {
    %c0 = arith.constant 0 : index
    %c0_0 = arith.constant 0 : index
    %c0_1 = arith.constant 0 : index
    %0 = vector.load %arg4[%c0, %c0_0, %c0_1] : memref<1x64x64xf32, #tpu.memory_space<vmem>>, vector<1x64x64xf32>
    %1 = vector.shape_cast %0 : vector<1x64x64xf32> to vector<64x64xf32>
    %c0_2 = arith.constant 0 : index
    %c0_3 = arith.constant 0 : index
    %2 = vector.load %arg3[%c0_2, %c0_3] : memref<64x64xf32, #tpu.memory_space<vmem>>, vector<64x64xf32>
    %cst = arith.constant dense<0.000000e+00> : vector<64x64xf32>
    %3 = tpu.matmul %2, %1, %cst {dimension_numbers = #tpu.dot_dimension_numbers<[1], [0], [0], [1], [0, 0, 1, 1], [], []>, precision = #tpu.contract_precision<fp32>} : vector<64x64xf32>, vector<64x64xf32>, vector<64x64xf32> -> vector<64x64xf32>
    %c0_4 = arith.constant 0 : index
    %c0_5 = arith.constant 0 : index
    %4 = vector.load %arg5[%c0_4, %c0_5] : memref<64x256xf32, #tpu.memory_space<vmem>>, vector<64x256xf32>
    %cst_6 = arith.constant dense<0.000000e+00> : vector<64x256xf32>
    %5 = tpu.matmul %3, %4, %cst_6 {dimension_numbers = #tpu.dot_dimension_numbers<[1], [0], [0], [1], [0, 0, 1, 1], [], []>} : vector<64x64xf32>, vector<64x256xf32>, vector<64x256xf32> -> vector<64x256xf32>
    %6 = vector.extract_strided_slice %5 {offsets = [0, 0], sizes = [16, 256], strides = [1, 1]} : vector<64x256xf32> to vector<16x256xf32>
    %c0_7 = arith.constant 0 : index
    %7 = memref.load %arg2[%c0_7] : memref<4xf32, #tpu.memory_space<smem>>
    %8 = vector.broadcast %7 : f32 to vector<16x256xf32>
    %9 = arith.addf %6, %8 : vector<16x256xf32>
    %c0_8 = arith.constant 0 : index
    %c0_9 = arith.constant 0 : index
    %c0_10 = arith.constant 0 : index
    %c0_11 = arith.constant 0 : index
    %10 = vector.load %arg6[%c0_8, %c0_9, %c0_10, %c0_11] : memref<1x4x16x256xf32, #tpu.memory_space<vmem>>, vector<1x1x16x256xf32>
    %11 = vector.shape_cast %10 : vector<1x1x16x256xf32> to vector<16x256xf32>
    %12 = vector.shape_cast %9 : vector<16x256xf32> to vector<1x1x16x256xf32>
    tpu.vector_store %arg6[%c0_8, %c0_9, %c0_10, %c0_11], %12 {strides = array<i32>} : memref<1x4x16x256xf32, #tpu.memory_space<vmem>>, vector<1x1x16x256xf32>,
    %13 = vector.extract_strided_slice %5 {offsets = [16, 0], sizes = [16, 256], strides = [1, 1]} : vector<64x256xf32> to vector<16x256xf32>
    %c1 = arith.constant 1 : index
    %14 = memref.load %arg2[%c1] : memref<4xf32, #tpu.memory_space<smem>>
    %15 = vector.broadcast %14 : f32 to vector<16x256xf32>
    %16 = arith.addf %13, %15 : vector<16x256xf32>
    %c0_12 = arith.constant 0 : index
    %c1_13 = arith.constant 1 : index
    %c0_14 = arith.constant 0 : index
    %c0_15 = arith.constant 0 : index
    %17 = vector.load %arg6[%c0_12, %c1_13, %c0_14, %c0_15] : memref<1x4x16x256xf32, #tpu.memory_space<vmem>>, vector<1x1x16x256xf32>
    %18 = vector.shape_cast %17 : vector<1x1x16x256xf32> to vector<16x256xf32>
    %19 = vector.shape_cast %16 : vector<16x256xf32> to vector<1x1x16x256xf32>
    tpu.vector_store %arg6[%c0_12, %c1_13, %c0_14, %c0_15], %19 {strides = array<i32>} : memref<1x4x16x256xf32, #tpu.memory_space<vmem>>, vector<1x1x16x256xf32>,
    %20 = vector.extract_strided_slice %5 {offsets = [32, 0], sizes = [16, 256], strides = [1, 1]} : vector<64x256xf32> to vector<16x256xf32>
    %c2 = arith.constant 2 : index
    %21 = memref.load %arg2[%c2] : memref<4xf32, #tpu.memory_space<smem>>
    %22 = vector.broadcast %21 : f32 to vector<16x256xf32>
    %23 = arith.addf %20, %22 : vector<16x256xf32>
    %c0_16 = arith.constant 0 : index
    %c2_17 = arith.constant 2 : index
    %c0_18 = arith.constant 0 : index
    %c0_19 = arith.constant 0 : index
    %24 = vector.load %arg6[%c0_16, %c2_17, %c0_18, %c0_19] : memref<1x4x16x256xf32, #tpu.memory_space<vmem>>, vector<1x1x16x256xf32>
    %25 = vector.shape_cast %24 : vector<1x1x16x256xf32> to vector<16x256xf32>
    %26 = vector.shape_cast %23 : vector<16x256xf32> to vector<1x1x16x256xf32>
    tpu.vector_store %arg6[%c0_16, %c2_17, %c0_18, %c0_19], %26 {strides = array<i32>} : memref<1x4x16x256xf32, #tpu.memory_space<vmem>>, vector<1x1x16x256xf32>,
    %27 = vector.extract_strided_slice %5 {offsets = [48, 0], sizes = [16, 256], strides = [1, 1]} : vector<64x256xf32> to vector<16x256xf32>
    %c3 = arith.constant 3 : index
    %28 = memref.load %arg2[%c3] : memref<4xf32, #tpu.memory_space<smem>>
    %29 = vector.broadcast %28 : f32 to vector<16x256xf32>
    %30 = arith.addf %27, %29 : vector<16x256xf32>
    %c0_20 = arith.constant 0 : index
    %c3_21 = arith.constant 3 : index
    %c0_22 = arith.constant 0 : index
    %c0_23 = arith.constant 0 : index
    %31 = vector.load %arg6[%c0_20, %c3_21, %c0_22, %c0_23] : memref<1x4x16x256xf32, #tpu.memory_space<vmem>>, vector<1x1x16x256xf32>
    %32 = vector.shape_cast %31 : vector<1x1x16x256xf32> to vector<16x256xf32>
    %33 = vector.shape_cast %30 : vector<16x256xf32> to vector<1x1x16x256xf32>
    tpu.vector_store %arg6[%c0_20, %c3_21, %c0_22, %c0_23], %33 {strides = array<i32>} : memref<1x4x16x256xf32, #tpu.memory_space<vmem>>, vector<1x1x16x256xf32>,
    return
  }
  func.func @transform_0(%arg0: i32, %arg1: i32) -> i32 {
    %c0_i32 = arith.constant 0 : i32
    %c0_i32_0 = arith.constant 0 : i32
    return %c0_i32 : i32
  }
  func.func @transform_1(%arg0: i32, %arg1: i32) -> (i32, i32) {
    %c0_i32 = arith.constant 0 : i32
    %c0_i32_0 = arith.constant 0 : i32
    return %arg1, %c0_i32 : i32, i32
  }
  func.func @transform_2(%arg0: i32, %arg1: i32) -> (i32, i32, i32) {
    %c0_i32 = arith.constant 0 : i32
    %c0_i32_0 = arith.constant 0 : i32
    %c0_i32_1 = arith.constant 0 : i32
    return %arg0, %c0_i32, %c0_i32_0 : i32, i32, i32
  }
  func.func @transform_3(%arg0: i32, %arg1: i32) -> (i32, i32) {
    %c0_i32 = arith.constant 0 : i32
    %c0_i32_0 = arith.constant 0 : i32
    %c0_i32_1 = arith.constant 0 : i32
    return %c0_i32, %c0_i32_0 : i32, i32
  }
  func.func @transform_4(%arg0: i32, %arg1: i32) -> (i32, i32, i32, i32) {
    %c0_i32 = arith.constant 0 : i32
    %c0_i32_0 = arith.constant 0 : i32
    %c0_i32_1 = arith.constant 0 : i32
    return %arg0, %c0_i32, %arg1, %c0_i32_0 : i32, i32, i32, i32
  }
}

</mosaic_0001>

<bundles_post_ra>
// kernel: up_conv_forward.1
= control target key start
LH: loop header
LB: loop body
LE: loop exit
PB: predicated region body
PF: predicated region fallthrough
CT: control target
= control target key end

     0   :  { %9 = vsyncpa [#allocation3], 0  ;;  %s1857_s15 = smov 0   ;;  %s1859_s16 = smov 0   ;;  %s2306_s0 = inlined_call_operand.vmem [shape: f32[4], index: 0, kind: input, shape index: {}]   ;;  %s2307_s1 = inlined_call_operand.vmem [shape: f32[64,64], index: 1, kind: input, shape index: {}]   ;;  %s2308_s2 = inlined_call_operand.vmem [shape: f32[2,64,64], index: 2, kind: input, shape index: {}]   ;;  %s2309_s3 = inlined_call_operand.vmem [shape: f32[64,256], index: 3, kind: input, shape index: {}]   ;;  %s2310_s4 = inlined_call_operand.vmem [shape: f32[2,4,16,256], index: 4, kind: output, shape index: {}]  }
   0x1   :  { %s1861_s17 = smov 0  }
   0x2 LB: > { %s1448_s18 = sadd.s32 4294967295, %s1828_s17   ;;  %s27_s19 = sadd.s32 1, %s1824_s16  ;;  %s1828_s17 = sphi %s1861_s17, %s15_s17   ;;  %s1824_s16 = sphi %s1859_s16, %s2314_s16   ;;  %s1820_s15 = sphi %s1857_s15, %s2313_s15  }
   0x3   : > { %p29_p0 = scmp.ge.s32.totalorder %s27_s19, 2  ;;  %p1450_p1 = scmp.ge.s32.totalorder %s1828_s17, 1 }
   0x4   : > { %p154_p2 = scmp.lt.s32.totalorder %s1828_s17, 3  ;;  %p1882_p4 = scmp.eq.s32.totalorder %s1448_s18, 0 }
   0x5   : > { %s2316_s19 = smov (%p29_p0, %s27_s19), 0  ;;  %s167_s24 = sshll.u32 %s2306_s0, 4  ;;  %s168_s24 = int_to_ptr.vmem [resolvable:$true] %s167_s24 }
   0x6   : > { %p1878_p3 = pnand %p1450_p1, %p154_p2  ;;  %s1787_s25 = scalar_lea.vmem %s168_s24, 16 }
   0x7   : > { %p1788_p7 = scmp.ne.s32.totalorder %s168_s24, %s1787_s25  ;;  %p1795_p11 = scmp.lt.s32.totalorder %s168_s24, %s168_s24 }
   0x8   : > { %p1755_p5 = pneg %p1878_p3  ;;  %p1796_p12 = scmp.lt.s32.totalorder %s1787_s25, %s1787_s25 }
   0xa   : > { %p1756_p6 = pnand %p1882_p4, %p1755_p5  ;;  %p1797_p13 = por %p1796_p12, %p1795_p11 }
   0xc   : > { %p1789_p8 = pneg %p1756_p6 }
   0xe   : > { %p1790_p9 = pnand %p1789_p8, %p1788_p7 }
  0x10   : > { %p1791_p10 = pneg %p1790_p9 }
  0x12   : > { %p1798_p0 = pnand %p1797_p13, %p1791_p10 }
  0x14   : > { %1801 = shalt.err (!%p1798_p0)
}
  0x15   : > { %s1830_s26 = smov [#allocation2]   ;;  %200 = sbr.rel (%p1878_p3) target bundleno = 529 (0x211), region = 36 }
  0x16   : > { %1758 = dma.vmem_to_smem (!%p1756_p6), %s168_s24, 16, %s1830_s26, [#allocation3]  }
  0x1a   : > { %1815 = dma.done.wait (%p1882_p4), [#allocation3], 16  }
  0x1b   : > { %1817 = vsyncadd (%p1882_p4), [#allocation3], 4294967280 }
  0x1c   : > { %206 = sfence }
  0x1d   : > { %p243_p1 = scmp.lt.s32.totalorder %s1820_s15, 1  ;;  %v267_v0 = vld [vmem:[%s2307_s1] sm:$0xff]  ;;  %vm275_vm0 = vcmask 523264   ;;  %v268_v1 = vld [vmem:[%s2307_s1 + $0x8] sm:$0xff]  ;;  %v269_v2 = vld [vmem:[%s2307_s1 + $0x10] sm:$0xff]  ;;  %s1468_s11 = sld [smem:[#allocation2 + $0x1]] }
  0x1e   : > { %v277_v3 = vsel %vm275_vm0, %v267_v0, 0  ;;  %v280_v4 = vsel %vm275_vm0, %v268_v1, 0  ;;  %v270_v6 = vld [vmem:[%s2307_s1 + $0x18] sm:$0xff]  ;;  %v283_v7 = vsel %vm275_vm0, %v269_v2, 0  ;;  %v271_v10 = vld [vmem:[%s2307_s1 + $0x20] sm:$0xff]  ;;  %v272_v12 = vld [vmem:[%s2307_s1 + $0x28] sm:$0xff] }
  0x1f   : > { %s2318_s15 = smov (!%p243_p1, %s1820_s15), 1  ;;  %v1914_v5 = vand.u32 4294901760, %v277_v3  ;;  %v1924_v9 = vand.u32 4294901760, %v280_v4  ;;  %v286_v11 = vsel %vm275_vm0, %v270_v6, 0  ;;  %v1942_v17 = vand.u32 4294901760, %v283_v7  ;;  %v273_v25 = vld [vmem:[%s2307_s1 + $0x30] sm:$0xff] }
  0x20   : > { %s1485_s9 = sshll.u32 %s2318_s15, 6  ;;  %v289_v20 = vsel %vm275_vm0, %v271_v10, 0  ;;  %v1957_v24 = vand.u32 4294901760, %v286_v11  ;;  %v292_v28 = vsel %vm275_vm0, %v272_v12, 0  ;;  %v295_v35 = vsel %vm275_vm0, %v273_v25, 0  ;;  %v274_v41 = vld [vmem:[%s2307_s1 + $0x38] sm:$0xff] }
  0x21   : > { %v1922_v8 = vsub.f32 %v277_v3, %v1914_v5  ;;  %s1932_s14 = scalar_lea.vmem %s2308_s2, %s1485_s9  ;;  %v1955_v23 = vsub.f32 %v280_v4, %v1924_v9  ;;  %v1970_v31 = vsub.f32 %v283_v7, %v1942_v17  ;;  %v1972_v32 = vand.u32 4294901760, %v289_v20  ;;  %s1291_s9 = sld [smem:[#allocation2]] }
  0x22   : > { %v266_v13 = vld [vmem:[%s1932_s14 + $0x38] sm:$0xff]  ;;  %v265_v14 = vld [vmem:[%s1932_s14 + $0x30] sm:$0xff]  ;;  %v264_v15 = vld [vmem:[%s1932_s14 + $0x28] sm:$0xff]  ;;  %v1987_v39 = vsub.f32 %v286_v11, %v1957_v24  ;;  %v1989_v40 = vand.u32 4294901760, %v292_v28  ;;  %v2007_v47 = vand.u32 4294901760, %v295_v35  ;;  %v298_v51 = vsel %vm275_vm0, %v274_v41, 0 }
  0x23   : > { %v375_v16 = vand.u32 4294901760, %v1922_v8  ;;  %1655 = vmatprep.mubr.f32.mxu0 %v1922_v8  ;;  %v1945_v18 = vand.u32 4294901760, %v266_v13  ;;  %v1947_v19 = vand.u32 4294901760, %v265_v14  ;;  %v263_v21 = vld [vmem:[%s1932_s14 + $0x20] sm:$0xff]  ;;  %v1963_v26 = vand.u32 4294901760, %v264_v15  ;;  %v262_v29 = vld [vmem:[%s1932_s14 + $0x18] sm:$0xff] }
  0x24   : > { %v1975_v33 = vand.u32 4294901760, %v263_v21  ;;  %v261_v36 = vld [vmem:[%s1932_s14 + $0x10] sm:$0xff]  ;;  %v385_v37 = vand.u32 4294901760, %v1955_v23  ;;  %v1995_v42 = vand.u32 4294901760, %v262_v29  ;;  %v260_v44 = vld [vmem:[%s1932_s14 + $0x8] sm:$0xff]  ;;  %v395_v45 = vand.u32 4294901760, %v1970_v31 }
  0x25   : > { %v376_v22 = vsub.f32 %v1922_v8, %v375_v16  ;;  %1583 = vmatprep.subr.mxu1 %v1945_v18  ;;  %v471_v27 = vsub.f32 %v266_v13, %v1945_v18  ;;  %v1978_v34 = vsub.f32 %v265_v14, %v1947_v19  ;;  %v1998_v43 = vsub.f32 %v264_v15, %v1963_v26  ;;  %v259_v52 = vld [vmem:[%s1932_s14] sm:$0xff]  ;;  %v1153_v8 = vld [vmem:[%s2309_s3 + $0x78] sm:$0xff]  ;;  %s1486_s10 = sshll.u32 %s2318_s15, 7  ;;  %s1473_s15 = sld [smem:[#allocation2 + $0x2]] }
  0x26   : > { %1584 = vmatpush3.msra.mxu1 %v1945_v18  ;;  %v2005_v46 = vsub.f32 %v289_v20, %v1972_v32  ;;  %v2010_v48 = vand.u32 4294901760, %v261_v36  ;;  %v2017_v50 = vsub.f32 %v263_v21, %v1975_v33  ;;  %v386_v53 = vsub.f32 %v1955_v23, %v385_v37  ;;  %s2279_s14 = scalar_lea.vmem %s2310_s4, %s1486_s10  ;;  %s1478_s18 = sld [smem:[#allocation2 + $0x3]] }
  0x27   : > { %v377_v30 = vand.u32 4294901760, %v376_v22  ;;  %1585 = vmatprep.subr.mxu1 %v1947_v19  ;;  %1639 = vmatprep.subr.mxu0 %v471_v27  ;;  %v1984_v38 = vand.u32 4294901760, %v471_v27  ;;  %v2013_v49 = vand.u32 4294901760, %v1978_v34  ;;  %v405_v55 = vand.u32 4294901760, %v1987_v39 }
  0x28   : > { %1586 = vmatpush3.msra.mxu1 %v1947_v19  ;;  %1640 = vmatpush3.msra.mxu0 %v471_v27  ;;  %v2029_v56 = vsub.f32 %v292_v28, %v1989_v40  ;;  %v2032_v57 = vand.u32 4294901760, %v260_v44  ;;  %v2035_v58 = vand.u32 4294901760, %v1998_v43  ;;  %v499_v59 = vsub.f32 %v262_v29, %v1995_v42 }
  0x29   : > { %1599 = vmatprep.mubr.f32.mxu1 %v377_v30  ;;  %1587 = vmatprep.subr.mxu1 %v1963_v26  ;;  %v473_v54 = vsub.f32 %v471_v27, %v1984_v38  ;;  %v396_v60 = vsub.f32 %v1970_v31, %v395_v45  ;;  %v415_v61 = vand.u32 4294901760, %v2005_v46  ;;  %v2046_v62 = vsub.f32 %v295_v35, %v2007_v47 }
  0x2a   : > { %1588 = vmatpush3.msra.mxu1 %v1963_v26  ;;  %1641 = vmatprep.subr.mxu0 %v1978_v34  ;;  %v2048_v63 = vand.u32 4294901760, %v298_v51  ;;  %v2051_v0 = vand.u32 4294901760, %v259_v52  ;;  %v480_v1 = vsub.f32 %v1978_v34, %v2013_v49  ;;  %v2056_v2 = vand.u32 4294901760, %v2017_v50 }
  0x2b   : > { %1589 = vmatprep.subr.mxu1 %v1975_v33  ;;  %1642 = vmatpush3.msra.mxu0 %v1978_v34  ;;  %v506_v3 = vsub.f32 %v261_v36, %v2010_v48  ;;  %v387_v4 = vand.u32 4294901760, %v386_v53  ;;  %v474_v6 = vand.u32 4294901760, %v473_v54  ;;  %v406_v7 = vsub.f32 %v1987_v39, %v405_v55 }
  0x2c   : > { %1590 = vmatpush3.msra.mxu1 %v1975_v33  ;;  %1643 = vmatprep.subr.mxu0 %v1998_v43  ;;  %v425_v10 = vand.u32 4294901760, %v2029_v56  ;;  %v487_v11 = vsub.f32 %v1998_v43, %v2035_v58  ;;  %v2068_v12 = vand.u32 4294901760, %v499_v59  ;;  %v2071_v13 = vsub.f32 %v298_v51, %v2048_v63 }
  0x2d   : > { %1591 = vmatprep.subr.mxu1 %v1995_v42  ;;  %1644 = vmatpush3.msra.mxu0 %v1998_v43  ;;  %v513_v14 = vsub.f32 %v260_v44, %v2032_v57  ;;  %v397_v15 = vand.u32 4294901760, %v396_v60  ;;  %v416_v20 = vsub.f32 %v2005_v46, %v415_v61  ;;  %v435_v21 = vand.u32 4294901760, %v2046_v62 }
  0x2e   : > { %1592 = vmatpush3.msra.mxu1 %v1995_v42  ;;  %1645 = vmatprep.subr.mxu0 %v2017_v50  ;;  %v481_v22 = vand.u32 4294901760, %v480_v1  ;;  %v494_v25 = vsub.f32 %v2017_v50, %v2056_v2  ;;  %v2082_v27 = vand.u32 4294901760, %v506_v3  ;;  %v520_v28 = vsub.f32 %v259_v52, %v2051_v0 }
  0x2f   : > { %1593 = vmatprep.subr.mxu1 %v2010_v48  ;;  %1646 = vmatpush3.msra.mxu0 %v2017_v50  ;;  %v407_v29 = vand.u32 4294901760, %v406_v7  ;;  %v426_v30 = vsub.f32 %v2029_v56, %v425_v10  ;;  %v488_v34 = vand.u32 4294901760, %v487_v11  ;;  %v501_v35 = vsub.f32 %v499_v59, %v2068_v12 }
  0x30   : > { %1594 = vmatpush3.msra.mxu1 %v2010_v48  ;;  %1647 = vmatprep.subr.mxu0 %v499_v59  ;;  %v445_v36 = vand.u32 4294901760, %v2071_v13  ;;  %v2091_v41 = vand.u32 4294901760, %v513_v14  ;;  %v417_v43 = vand.u32 4294901760, %v416_v20  ;;  %v436_v44 = vsub.f32 %v2046_v62, %v435_v21 }
  0x31   : > { %1595 = vmatprep.subr.mxu1 %v2032_v57  ;;  %1648 = vmatpush3.msra.mxu0 %v499_v59  ;;  %v495_v50 = vand.u32 4294901760, %v494_v25  ;;  %v508_v51 = vsub.f32 %v506_v3, %v2082_v27  ;;  %v2097_v52 = vand.u32 4294901760, %v520_v28  ;;  %v427_v53 = vand.u32 4294901760, %v426_v30 }
  0x32   : > { %1596 = vmatpush3.msra.mxu1 %v2032_v57  ;;  %1649 = vmatprep.subr.mxu0 %v506_v3  ;;  %v502_v54 = vand.u32 4294901760, %v501_v35  ;;  %v446_v59 = vsub.f32 %v2071_v13, %v445_v36  ;;  %v515_v60 = vsub.f32 %v513_v14, %v2091_v41  ;;  %v437_v1 = vand.u32 4294901760, %v436_v44 }
  0x33   : > { %1597 = vmatprep.subr.mxu1 %v2051_v0  ;;  %1650 = vmatpush3.msra.mxu0 %v506_v3  ;;  %v509_v3 = vand.u32 4294901760, %v508_v51 }
  0x34   : > { %1598 = vmatpush3.msra.mxu1 %v2051_v0  ;;  %1651 = vmatprep.subr.mxu0 %v513_v14  ;;  %v516_v7 = vand.u32 4294901760, %v515_v60 }
  0x35   : > { %1600 = vmatmul.mubr.f32.vlgmr.msra.gmra.mxu1 %v387_v4  ;;  %1611 = vmatprep.subr.mxu1 %v474_v6  ;;  %v522_v4 = vsub.f32 %v520_v28, %v2097_v52 }
  0x36   : > { %1612 = vmatpush3.msra.mxu1 %v474_v6  ;;  %1602 = vmatprep.mubr.f32.mxu1 %v397_v15  ;;  %v447_v6 = vand.u32 4294901760, %v446_v59 }
  0x37   : > { %1613 = vmatprep.subr.mxu1 %v481_v22  ;;  %1652 = vmatpush3.msra.mxu0 %v513_v14  ;;  %v523_v11 = vand.u32 4294901760, %v522_v4 }
  0x38   : > { %1614 = vmatpush3.msra.mxu1 %v481_v22  ;;  %1653 = vmatprep.subr.mxu0 %v520_v28 }
  0x39   : > { %1603 = vmatmul.mubr.f32.gmra.mxu1 %v407_v29  ;;  %1615 = vmatprep.subr.mxu1 %v488_v34 }
  0x3a   : > { %1616 = vmatpush3.msra.mxu1 %v488_v34  ;;  %1605 = vmatprep.mubr.f32.mxu1 %v417_v43 }
  0x3b   : > { %1617 = vmatprep.subr.mxu1 %v495_v50  ;;  %1654 = vmatpush3.msra.mxu0 %v520_v28 }
  0x3c   : > { %1618 = vmatpush3.msra.mxu1 %v495_v50  ;;  %1656 = vmatmul.mubr.f32.vlgmr.msra.gmra.mxu0 %v1955_v23  ;;  %v1146_v23 = vld [vmem:[%s2309_s3 + $0x40] sm:$0xff] }
  0x3d   : > { %1606 = vmatmul.mubr.f32.gmra.mxu1 %v427_v53  ;;  %1619 = vmatprep.subr.mxu1 %v502_v54 }
  0x3e   : > { %1620 = vmatpush3.msra.mxu1 %v502_v54  ;;  %1608 = vmatprep.mubr.f32.mxu1 %v437_v1 }
  0x3f   : > { %1621 = vmatprep.subr.mxu1 %v509_v3  ;;  %1695 = vmatprep.subr.mxu0 %v1984_v38 }
  0x40   : > { %1622 = vmatpush3.msra.mxu1 %v509_v3  ;;  %1696 = vmatpush3.msra.mxu0 %v1984_v38  ;;  %v1139_v38 = vld [vmem:[%s2309_s3 + $0x8] sm:$0xff] }
  0x41   : > { %1609 = vmatmul.mubr.f32.gmra.mxu1 %v447_v6  ;;  %1623 = vmatprep.subr.mxu1 %v516_v7 }
  0x42   : > { %1624 = vmatpush3.msra.mxu1 %v516_v7  ;;  %1627 = vmatprep.mubr.f32.mxu1 %v1914_v5 }
  0x43   : > { %1625 = vmatprep.subr.mxu1 %v523_v11  ;;  %1697 = vmatprep.subr.mxu0 %v2013_v49 }
  0x44   : > { %1626 = vmatpush3.msra.mxu1 %v523_v11  ;;  %1658 = vmatprep.mubr.f32.mxu0 %v1970_v31  ;;  %v1143_v31 = vld [vmem:[%s2309_s3 + $0x28] sm:$0xff] }
  0x45   : > { %1628 = vmatmul.mubr.f32.vlgmr.msra.gmra.mxu1 %v1924_v9  ;;  %1667 = vmatprep.subr.mxu1 %v1945_v18 }
  0x46   : > { %1668 = vmatpush3.msra.mxu1 %v1945_v18  ;;  %1630 = vmatprep.mubr.f32.mxu1 %v1942_v17 }
  0x47   : > { %1669 = vmatprep.subr.mxu1 %v1947_v19  ;;  %1698 = vmatpush3.msra.mxu0 %v2013_v49 }
  0x48   : > { %1670 = vmatpush3.msra.mxu1 %v1947_v19  ;;  %1659 = vmatmul.mubr.f32.gmra.mxu0 %v1987_v39  ;;  %v1138_v39 = vld [vmem:[%s2309_s3] sm:$0xff] }
  0x49   : > { %1631 = vmatmul.mubr.f32.gmra.mxu1 %v1957_v24  ;;  %1671 = vmatprep.subr.mxu1 %v1963_v26 }
  0x4a   : > { %1672 = vmatpush3.msra.mxu1 %v1963_v26  ;;  %1699 = vmatprep.subr.mxu0 %v2035_v58 }
  0x4b   : > { %1673 = vmatprep.subr.mxu1 %v1975_v33  ;;  %1633 = vmatprep.mubr.f32.mxu1 %v1972_v32 }
  0x4c   : > { %1674 = vmatpush3.msra.mxu1 %v1975_v33  ;;  %1700 = vmatpush3.msra.mxu0 %v2035_v58 }
  0x4d   : > { %1634 = vmatmul.mubr.f32.gmra.mxu1 %v1989_v40  ;;  %1675 = vmatprep.subr.mxu1 %v1995_v42 }
  0x4e   : > { %1701 = vmatprep.subr.mxu0 %v2056_v2  ;;  %1661 = vmatprep.mubr.f32.mxu0 %v2005_v46 }
  0x4f   : > { %1676 = vmatpush3.msra.mxu1 %v1995_v42  ;;  %1702 = vmatpush3.msra.mxu0 %v2056_v2 }
  0x50   : > { %1662 = vmatmul.mubr.f32.gmra.mxu0 %v2029_v56  ;;  %1677 = vmatprep.subr.mxu1 %v2010_v48 }
  0x51   : > { %1703 = vmatprep.subr.mxu0 %v2068_v12  ;;  %1636 = vmatprep.mubr.f32.mxu1 %v2007_v47 }
  0x52   : > { %1678 = vmatpush3.msra.mxu1 %v2010_v48  ;;  %1704 = vmatpush3.msra.mxu0 %v2068_v12 }
  0x53   : > { %1637 = vmatmul.mubr.f32.gmra.mxu1 %v2048_v63  ;;  %1679 = vmatprep.subr.mxu1 %v2032_v57 }
  0x54   : > { %1705 = vmatprep.subr.mxu0 %v2082_v27  ;;  %1664 = vmatprep.mubr.f32.mxu0 %v2046_v62 }
  0x55   : > { %1680 = vmatpush3.msra.mxu1 %v2032_v57  ;;  %1706 = vmatpush3.msra.mxu0 %v2082_v27 }
  0x56   : > { %1665 = vmatmul.mubr.f32.gmra.mxu0 %v2071_v13  ;;  %1681 = vmatprep.subr.mxu1 %v2051_v0 }
  0x57   : > { %1707 = vmatprep.subr.mxu0 %v2091_v41  ;;  %1682 = vmatpush3.msra.mxu1 %v2051_v0 }
  0x58   : > { %1683 = vmatprep.mubr.f32.mxu1 %v375_v16  ;;  %1708 = vmatpush3.msra.mxu0 %v2091_v41  ;;  %v1150_v16 = vld [vmem:[%s2309_s3 + $0x60] sm:$0xff] }
  0x59   : > { %1684 = vmatmul.mubr.f32.vlgmr.msra.gmra.mxu1 %v385_v37  ;;  %1709 = vmatprep.subr.mxu0 %v2097_v52  ;;  %v1140_v37 = vld [vmem:[%s2309_s3 + $0x10] sm:$0xff] }
  0x5a   : > { %1723 = vmatprep.subr.mxu1 %v1945_v18  ;;  %1710 = vmatpush3.msra.mxu0 %v2097_v52 }
  0x5b   : > { %1711 = vmatprep.mubr.f32.mxu0 %v1914_v5  ;;  %1724 = vmatpush3.msra.mxu1 %v1945_v18  ;;  %v1148_v18 = vld [vmem:[%s2309_s3 + $0x50] sm:$0xff] }
  0x5c   : > { %1712 = vmatmul.mubr.f32.vlgmr.msra.gmra.mxu0 %v1924_v9  ;;  %1725 = vmatprep.subr.mxu1 %v1947_v19 }
  0x5d   : > { %1686 = vmatprep.mubr.f32.mxu1 %v395_v45  ;;  %1726 = vmatpush3.msra.mxu1 %v1947_v19  ;;  %v1147_v19 = vld [vmem:[%s2309_s3 + $0x48] sm:$0xff] }
  0x5e   : > { %1687 = vmatmul.mubr.f32.gmra.mxu1 %v405_v55  ;;  %1727 = vmatprep.subr.mxu1 %v1963_v26 }
  0x5f   : > { %1714 = vmatprep.mubr.f32.mxu0 %v1942_v17  ;;  %1728 = vmatpush3.msra.mxu1 %v1963_v26  ;;  %v1144_v26 = vld [vmem:[%s2309_s3 + $0x30] sm:$0xff] }
  0x60   : > { %1715 = vmatmul.mubr.f32.gmra.mxu0 %v1957_v24  ;;  %1729 = vmatprep.subr.mxu1 %v1975_v33 }
  0x61   : > { %1689 = vmatprep.mubr.f32.mxu1 %v415_v61  ;;  %1730 = vmatpush3.msra.mxu1 %v1975_v33  ;;  %v1141_v33 = vld [vmem:[%s2309_s3 + $0x18] sm:$0xff] }
  0x62   : > { %1690 = vmatmul.mubr.f32.gmra.mxu1 %v425_v10  ;;  %1731 = vmatprep.subr.mxu1 %v1995_v42 }
  0x63   : > { %1717 = vmatprep.mubr.f32.mxu0 %v1972_v32  ;;  %1732 = vmatpush3.msra.mxu1 %v1995_v42 }
  0x64   : > { %1718 = vmatmul.mubr.f32.gmra.mxu0 %v1989_v40  ;;  %1733 = vmatprep.subr.mxu1 %v2010_v48 }
  0x65   : > { %1692 = vmatprep.mubr.f32.mxu1 %v435_v21  ;;  %1734 = vmatpush3.msra.mxu1 %v2010_v48 }
  0x66   : > { %1693 = vmatmul.mubr.f32.gmra.mxu1 %v445_v36  ;;  %1735 = vmatprep.subr.mxu1 %v2032_v57 }
  0x67   : > { %1720 = vmatprep.mubr.f32.mxu0 %v2007_v47  ;;  %1736 = vmatpush3.msra.mxu1 %v2032_v57 }
  0x68   : > { %1721 = vmatmul.mubr.f32.gmra.mxu0 %v2048_v63  ;;  %1737 = vmatprep.subr.mxu1 %v2051_v0 }
  0x69   : > { %1738 = vmatpush3.msra.mxu1 %v2051_v0  ;;  %1739 = vmatprep.mubr.f32.mxu1 %v1914_v5  ;;  %v1152_v5 = vld [vmem:[%s2309_s3 + $0x70] sm:$0xff] }
  0x6a   : > { %1740 = vmatmul.mubr.f32.vlgmr.msra.gmra.mxu1 %v1924_v9  ;;  %1194 = vmatprep.subr.mxu0 %v1153_v8  ;;  %v1151_v9 = vld [vmem:[%s2309_s3 + $0x68] sm:$0xff] }
  0x6b   : > { %1742 = vmatprep.mubr.f32.mxu1 %v1942_v17  ;;  %1195 = vmatpush1.msra.mxu0 %v1152_v5  ;;  %v1149_v17 = vld [vmem:[%s2309_s3 + $0x58] sm:$0xff] }
  0x6c   : > { %1196 = vmatprep.subr.mxu0 %v1151_v9 }
  0x6d   : > { %1197 = vmatpush1.msra.mxu0 %v1150_v16 }
  0x6e   : > { %1743 = vmatmul.mubr.f32.gmra.mxu1 %v1957_v24  ;;  %1198 = vmatprep.subr.mxu0 %v1149_v17  ;;  %v1145_v24 = vld [vmem:[%s2309_s3 + $0x38] sm:$0xff] }
  0x6f   : > { %1745 = vmatprep.mubr.f32.mxu1 %v1972_v32  ;;  %1199 = vmatpush1.msra.mxu0 %v1148_v18  ;;  %v1142_v32 = vld [vmem:[%s2309_s3 + $0x20] sm:$0xff] }
  0x70   : > { %1200 = vmatprep.subr.mxu0 %v1147_v19 }
  0x71   : > { %1201 = vmatpush1.msra.mxu0 %v1146_v23 }
  0x72   : > { %1746 = vmatmul.mubr.f32.gmra.mxu1 %v1989_v40  ;;  %1202 = vmatprep.subr.mxu0 %v1145_v24  ;;  %v1831_v40 = vmov 0.0  }
  0x73   : > { %1748 = vmatprep.mubr.f32.mxu1 %v2007_v47  ;;  %1203 = vmatpush1.msra.mxu0 %v1144_v26 }
  0x74   : > { %1204 = vmatprep.subr.mxu0 %v1143_v31  ;;  %1242 = vmatprep.mubr.f32.mxu0 %v1831_v40 }
  0x75   : > { %1205 = vmatpush1.msra.mxu0 %v1142_v32 }
  0x76   : > { %1749 = vmatmul.mubr.f32.gmra.mxu1 %v2048_v63  ;;  %1206 = vmatprep.subr.mxu0 %v1141_v33 }
  0x77   : > { %1207 = vmatpush1.msra.mxu0 %v1140_v37 }
  0x78   : > { %1208 = vmatprep.subr.mxu0 %v1139_v38 }
  0x79   : > { %1209 = vmatpush1.msra.mxu0 %v1138_v39 }
  0xf5   : > { %v1601_v42 = vpop.f32.mrf.mxu1 }
  0xf7   : > { %v379_v45 = vpop.f32.mrf.mxu1 }
  0xf9   : > { %v1604_v46 = vpop.f32.mrf.mxu1 }
  0xfb   : > { %v399_v47 = vpop.f32.mrf.mxu1 }
  0xfc   : > { %v1657_v57 = vpop.f32.mrf.mxu0 }
  0xfd   : > { %v1607_v48 = vpop.f32.mrf.mxu1 }
  0xfe   : > { %v690_v62 = vpop.f32.mrf.mxu0 }
  0xff   : > { %v419_v49 = vpop.f32.mrf.mxu1 }
 0x101   : > { %v2248_v55 = vpop.f32.mrf.mxu1 }
 0x103   : > { %v2250_v56 = vpop.f32.mrf.mxu1 }
 0x105   : > { %v1629_v58 = vpop.f32.mrf.mxu1 }
 0x106   : > { %v567_v43 = vadd.f32 %v1629_v58, %v1601_v42 }
 0x107   : > { %v560_v61 = vpop.f32.mrf.mxu1 }
 0x108   : > { %v1660_v2 = vpop.f32.mrf.mxu0  ;;  %v561_v34 = vadd.f32 %v560_v61, %v379_v45  ;;  %v698_v54 = vadd.f32 %v1657_v57, %v567_v43  ;;  %v1302_v43 = vstv %s1468_s11 }
 0x109   : > { %v1632_v63 = vpop.f32.mrf.mxu1 }
 0x10a   : > { %v704_v13 = vpop.f32.mrf.mxu0  ;;  %v691_v44 = vadd.f32 %v690_v62, %v561_v34  ;;  %v579_v7 = vadd.f32 %v1632_v63, %v1604_v46 }
 0x10b   : > { %v572_v0 = vpop.f32.mrf.mxu1 }
 0x10c   : > { %v573_v59 = vadd.f32 %v572_v0, %v399_v47  ;;  %v712_v18 = vadd.f32 %v1660_v2, %v579_v7 }
 0x10d   : > { %v1635_v10 = vpop.f32.mrf.mxu1 }
 0x10e   : > { %v705_v11 = vadd.f32 %v704_v13, %v573_v59  ;;  %v591_v33 = vadd.f32 %v1635_v10, %v1607_v48 }
 0x10f   : > { %v584_v12 = vpop.f32.mrf.mxu1 }
 0x110   : > { %v1663_v15 = vpop.f32.mrf.mxu0  ;;  %v585_v19 = vadd.f32 %v584_v12, %v419_v49 }
 0x111   : > { %v726_v47 = vadd.f32 %v1663_v15, %v591_v33 }
 0x112   : > { %v718_v21 = vpop.f32.mrf.mxu0 }
 0x113   : > { %v2252_v14 = vpop.f32.mrf.mxu1  ;;  %v719_v37 = vadd.f32 %v718_v21, %v585_v19 }
 0x114   : > { %v603_v63 = vadd.f32 %v2252_v14, %v2248_v55 }
 0x115   : > { %v596_v20 = vpop.f32.mrf.mxu1 }
 0x116   : > { %v2254_v27 = vpop.f32.mrf.mxu0  ;;  %v597_v49 = vadd.f32 %v596_v20, %v2250_v56 }
 0x117   : > { %v740_v15 = vadd.f32 %v2254_v27, %v603_v63  ;;  %v1292_v27 = vstv %s1291_s9 }
 0x118   : > { %v732_v29 = vpop.f32.mrf.mxu0 }
 0x119   : > { %v1685_v22 = vpop.f32.mrf.mxu1  ;;  %v733_v0 = vadd.f32 %v732_v29, %v597_v49 }
 0x11a   : > { %v829_v1 = vadd.f32 %v1685_v22, %v698_v54 }
 0x11b   : > { %v820_v25 = vpop.f32.mrf.mxu1 }
 0x11c   : > { %v1713_v36 = vpop.f32.mrf.mxu0  ;;  %v821_v51 = vadd.f32 %v820_v25, %v691_v44 }
 0x11d   : > { %v978_v9 = vadd.f32 %v1713_v36, %v829_v1  ;;  %v1313_v1 = vstv %s1473_s15 }
 0x11e   : > { %v1688_v28 = vpop.f32.mrf.mxu1  ;;  %v971_v52 = vpop.f32.mrf.mxu0 }
 0x11f   : > { %v972_v3 = vadd.f32 %v971_v52, %v821_v51  ;;  %v845_v26 = vadd.f32 %v1688_v28, %v712_v18 }
 0x120   : > { %v836_v30 = vpop.f32.mrf.mxu1  ;;  %v1716_v4 = vpop.f32.mrf.mxu0 }
 0x121   : > { %v837_v16 = vadd.f32 %v836_v30, %v705_v11  ;;  %v990_v42 = vadd.f32 %v1716_v4, %v845_v26 }
 0x122   : > { %v1691_v35 = vpop.f32.mrf.mxu1  ;;  %v983_v17 = vpop.f32.mrf.mxu0 }
 0x123   : > { %v984_v31 = vadd.f32 %v983_v17, %v837_v16  ;;  %v861_v61 = vadd.f32 %v1691_v35, %v726_v47  ;;  %v1324_v16 = vstv %s1478_s18 }
 0x124   : > { %v852_v41 = vpop.f32.mrf.mxu1  ;;  %v1719_v32 = vpop.f32.mrf.mxu0 }
 0x125   : > { %v853_v45 = vadd.f32 %v852_v41, %v719_v37  ;;  %v1002_v12 = vadd.f32 %v1719_v32, %v861_v61 }
 0x126   : > { %v1694_v50 = vpop.f32.mrf.mxu1  ;;  %v995_v46 = vpop.f32.mrf.mxu0 }
 0x127   : > { %v996_v62 = vadd.f32 %v995_v46, %v853_v45  ;;  %v877_v22 = vadd.f32 %v1694_v50, %v740_v15 }
 0x128   : > { %v868_v53 = vpop.f32.mrf.mxu1  ;;  %v1722_v48 = vpop.f32.mrf.mxu0 }
 0x129   : > { %v869_v13 = vadd.f32 %v868_v53, %v733_v0  ;;  %v1014_v14 = vadd.f32 %v1722_v48, %v877_v22 }
 0x12a   : > { %v1741_v60 = vpop.f32.mrf.mxu1  ;;  %v1007_v56 = vpop.f32.mrf.mxu0 }
 0x12b   : > { %v1099_v23 = vadd.f32 %v1741_v60, %v978_v9  ;;  %v1008_v25 = vadd.f32 %v1007_v56, %v869_v13 }
 0x12c   : > { %v1092_v6 = vpop.f32.mrf.mxu1 }
 0x12d   : > { %v1093_v8 = vadd.f32 %v1092_v6, %v972_v3 }
 0x12e   : > { %v1744_v5 = vpop.f32.mrf.mxu1 }
 0x12f   : > { %1460 = vmatmul.mubr.msk.f32.vlgmr.msra.gmra.mxu0 %vm275_vm0, %v1093_v8  ;;  %v1111_v57 = vadd.f32 %v1744_v5, %v990_v42 }
 0x130   : > { %1248 = vmatprep.mubr.f32.mxu0 %v1831_v40  ;;  %v1104_v24 = vpop.f32.mrf.mxu1 }
 0x131   : > { %v1105_v38 = vadd.f32 %v1104_v24, %v984_v31 }
 0x132   : > { %v1747_v39 = vpop.f32.mrf.mxu1 }
 0x133   : > { %1461 = vmatmul.mubr.msk.f32.gmra.mxu0 %vm275_vm0, %v1099_v23  ;;  %v1123_v20 = vadd.f32 %v1747_v39, %v1002_v12 }
 0x134   : > { %1254 = vmatprep.mubr.f32.mxu0 %v1831_v40  ;;  %v1116_v58 = vpop.f32.mrf.mxu1 }
 0x135   : > { %v1117_v2 = vadd.f32 %v1116_v58, %v996_v62 }
 0x136   : > { %v1750_v10 = vpop.f32.mrf.mxu1 }
 0x137   : > { %1462 = vmatmul.mubr.msk.f32.gmra.mxu0 %vm275_vm0, %v1105_v38  ;;  %v1135_v28 = vadd.f32 %v1750_v10, %v1014_v14 }
 0x138   : > { %1260 = vmatprep.mubr.f32.mxu0 %v1831_v40  ;;  %v1128_v21 = vpop.f32.mrf.mxu1 }
 0x139   : > { %v1129_v55 = vadd.f32 %v1128_v21, %v1008_v25 }
 0x13b   : > { %1463 = vmatmul.mubr.msk.f32.gmra.mxu0 %vm275_vm0, %v1111_v57 }
 0x13c   : > { %1266 = vmatprep.mubr.f32.mxu0 %v1831_v40 }
 0x13f   : > { %1464 = vmatmul.mubr.msk.f32.gmra.mxu0 %vm275_vm0, %v1117_v2 }
 0x140   : > { %1272 = vmatprep.mubr.f32.mxu0 %v1831_v40 }
 0x143   : > { %1465 = vmatmul.mubr.msk.f32.gmra.mxu0 %vm275_vm0, %v1123_v20 }
 0x144   : > { %1278 = vmatprep.mubr.f32.mxu0 %v1831_v40 }
 0x147   : > { %1466 = vmatmul.mubr.msk.f32.gmra.mxu0 %vm275_vm0, %v1129_v55 }
 0x148   : > { %1284 = vmatprep.mubr.f32.mxu0 %v1831_v40 }
 0x14b   : > { %1467 = vmatmul.mubr.msk.f32.gmra.mxu0 %vm275_vm0, %v1135_v28 }
 0x1ef   : > { %v1244_v29 = vpop.f32.mrf.mxu0 }
 0x1f0   : > { %v1293_v30 = vadd.f32 %v1292_v27, %v1244_v29 }
 0x1f1   : > { %v1246_v40 = vpop.f32.mrf.mxu0 }
 0x1f2   : > { %1297 = vst [vmem:[%s2279_s14] sm:$0xff] %v1293_v30  ;;  %v1294_v34 = vadd.f32 %v1292_v27, %v1246_v40 }
 0x1f3   : > { %v1250_v35 = vpop.f32.mrf.mxu0 }
 0x1f4   : > { %1298 = vst [vmem:[%s2279_s14 + $0x8] sm:$0xff] %v1294_v34  ;;  %v1295_v36 = vadd.f32 %v1292_v27, %v1250_v35 }
 0x1f5   : > { %v1252_v41 = vpop.f32.mrf.mxu0 }
 0x1f6   : > { %1299 = vst [vmem:[%s2279_s14 + $0x10] sm:$0xff] %v1295_v36  ;;  %v1296_v44 = vadd.f32 %v1292_v27, %v1252_v41 }
 0x1f7   : > { %v1256_v50 = vpop.f32.mrf.mxu0 }
 0x1f8   : > { %1300 = vst [vmem:[%s2279_s14 + $0x18] sm:$0xff] %v1296_v44  ;;  %v1303_v51 = vadd.f32 %v1302_v43, %v1256_v50 }
 0x1f9   : > { %v1258_v52 = vpop.f32.mrf.mxu0 }
 0x1fa   : > { %1469 = vst [vmem:[%s2279_s14 + $0x20] sm:$0xff] %v1303_v51  ;;  %v1304_v53 = vadd.f32 %v1302_v43, %v1258_v52 }
 0x1fb   : > { %v1262_v54 = vpop.f32.mrf.mxu0 }
 0x1fc   : > { %1470 = vst [vmem:[%s2279_s14 + $0x28] sm:$0xff] %v1304_v53  ;;  %v1305_v59 = vadd.f32 %v1302_v43, %v1262_v54 }
 0x1fd   : > { %v1264_v60 = vpop.f32.mrf.mxu0 }
 0x1fe   : > { %1471 = vst [vmem:[%s2279_s14 + $0x30] sm:$0xff] %v1305_v59  ;;  %v1306_v3 = vadd.f32 %v1302_v43, %v1264_v60 }
 0x1ff   : > { %v1268_v4 = vpop.f32.mrf.mxu0 }
 0x200   : > { %1472 = vst [vmem:[%s2279_s14 + $0x38] sm:$0xff] %v1306_v3  ;;  %v1314_v6 = vadd.f32 %v1313_v1, %v1268_v4 }
 0x201   : > { %v1270_v7 = vpop.f32.mrf.mxu0 }
 0x202   : > { %1474 = vst [vmem:[%s2279_s14 + $0x40] sm:$0xff] %v1314_v6  ;;  %v1315_v11 = vadd.f32 %v1313_v1, %v1270_v7 }
 0x203   : > { %v1274_v8 = vpop.f32.mrf.mxu0 }
 0x204   : > { %1475 = vst [vmem:[%s2279_s14 + $0x48] sm:$0xff] %v1315_v11  ;;  %v1316_v5 = vadd.f32 %v1313_v1, %v1274_v8 }
 0x205   : > { %v1276_v9 = vpop.f32.mrf.mxu0 }
 0x206   : > { %1476 = vst [vmem:[%s2279_s14 + $0x50] sm:$0xff] %v1316_v5  ;;  %v1317_v17 = vadd.f32 %v1313_v1, %v1276_v9 }
 0x207   : > { %v1280_v18 = vpop.f32.mrf.mxu0 }
 0x208   : > { %1477 = vst [vmem:[%s2279_s14 + $0x58] sm:$0xff] %v1317_v17  ;;  %v1325_v19 = vadd.f32 %v1324_v16, %v1280_v18 }
 0x209   : > { %v1282_v23 = vpop.f32.mrf.mxu0 }
 0x20a   : > { %1479 = vst [vmem:[%s2279_s14 + $0x60] sm:$0xff] %v1325_v19  ;;  %v1326_v24 = vadd.f32 %v1324_v16, %v1282_v23 }
 0x20b   : > { %v1286_v26 = vpop.f32.mrf.mxu0 }
 0x20c   : > { %1480 = vst [vmem:[%s2279_s14 + $0x68] sm:$0xff] %v1326_v24  ;;  %v1327_v31 = vadd.f32 %v1324_v16, %v1286_v26 }
 0x20d   : > { %v1288_v32 = vpop.f32.mrf.mxu0 }
 0x20e   : > { %1481 = vst [vmem:[%s2279_s14 + $0x70] sm:$0xff] %v1327_v31  ;;  %v1328_v33 = vadd.f32 %v1324_v16, %v1288_v32 }
 0x210   : > { %1482 = vst [vmem:[%s2279_s14 + $0x78] sm:$0xff] %v1328_v33 }
 0x211 PF: > { %s15_s17 = sadd.s32 1, %s1828_s17   ;;  %s2313_s15 = smov %s1824_s16 }
 0x212   : > { %p12_p2 = scmp.ge.s32.totalorder %s15_s17, 4   ;;  %s2314_s16 = smov %s2316_s19 }
 0x214   :  { %14 = sbr.rel (!%p12_p2) target bundleno = 2 (0x2), region = 77 }
 0x219   :  { %1366 = vsyncpa [#allocation3], 1 }
 0x21a   :  { %1368 = vsyncpa [#allocation3 + $0x1], 1 }

</bundles_post_ra>
